<compile_context>
chip_gen: v5e
topology: v5e:2x2
jax: 0.10.0
libtpu: 0.0.40
codegen_flags: <defaults>
</compile_context>

<pallas_src>
import numpy as np

import jax
import jax.numpy as jnp
from jax import lax
from jax.experimental import pallas as pl
from jax.experimental.pallas import tpu as pltpu

# Problem sizes (small, consistent with a VGG conv block: Conv2d(4, 8, 3, pad=1)).
N, C_IN, H, W = 2, 4, 16, 16
C_OUT = 8
KH = KW = 3
BN_EPS = 1e-5

WC = W * C_OUT            # 128 -> lane-dense output width
WPC = (W + 2) * C_IN      # 72  -> packed (padded-width, C_IN) input row
K_RAW = KH * WPC          # 216 -> kh-folded contraction depth
K_PAD = 256               # zero-pad K to fill the MXU / align lanes


def _prepare_conv_weights(w_hwio):
    """(KH, KW, C_IN, C_OUT) -> (K_PAD, W*C_OUT) bf16 banded-matmul weight slab.

    wt[kh*WPC + (w+kw)*C_IN + ci, w*C_OUT + co] = w_hwio[kh, kw, ci, co]
    so an im2col'd padded-row triple (length KH*WPC) @ wt yields one full
    lane-dense output row of the 3x3 SAME convolution.
    Built once per weight update (hoisted out of the per-call jit path).
    """
    eye_w = jnp.eye(W, dtype=jnp.float32)
    mats = []
    for kh in range(KH):
        m = jnp.zeros((WPC, WC), dtype=jnp.float32)
        for kw in range(KW):
            blk = jnp.kron(eye_w, w_hwio[kh, kw].astype(jnp.float32))  # (W*C_IN, W*C_OUT)
            m = m + jnp.pad(blk, ((kw * C_IN, (KW - 1 - kw) * C_IN), (0, 0)))
        mats.append(m)
    wt = jnp.concatenate(mats, axis=0)                     # (216, 128)
    wt = jnp.pad(wt, ((0, K_PAD - K_RAW), (0, 0)))         # (256, 128)
    return wt.astype(jnp.bfloat16)


def _bn_indicator_constants():
    """Lane<->channel indicator matrices as compile-time constants.

    Lane l = w*C_OUT + co  =>  channel(l) = l % C_OUT.
    gather: (W*C_OUT, C_OUT) sums lanes into channels; scatter = gather.T.
    """
    gather = np.tile(np.eye(C_OUT, dtype=np.float32), (W, 1))   # (128, 8)
    scatter = gather.T.copy()                                    # (8, 128)
    return jnp.asarray(gather), jnp.asarray(scatter)


def vgg_block_kernel(lhs_ref, wt_ref, gb_ref, gather_ref, scatter_ref, o_ref):
    """Fused conv3x3 (pad=1) + BatchNorm2d (batch stats) + ReLU.

    lhs_ref:     (N*H, 256)  bf16  kh-im2col'd, zero-padded input rows
    wt_ref:      (256, 128)  bf16  banded conv weights (kh/kw/C_IN folded into K)
    gb_ref:      (2, C_OUT)  f32   row 0 = gamma, row 1 = beta
    gather_ref:  (128, 8)    f32   lane -> channel indicator
    scatter_ref: (8, 128)    f32   channel -> lane indicator
    o_ref:       (N*H, 128)  f32   lane-dense output slab
    """
    # ---- Convolution: one dense MXU matmul, f32 accumulation.
    acc = jnp.dot(lhs_ref[...], wt_ref[...],
                  preferred_element_type=jnp.float32)            # (32, 128) f32

    # ---- BatchNorm2d (training-mode batch stats), single pass, stats in f32.
    stats_lane = jnp.concatenate(
        [jnp.sum(acc, axis=0, keepdims=True),
         jnp.sum(acc * acc, axis=0, keepdims=True)], axis=0)     # (2, 128)
    stats_c = jnp.dot(stats_lane, gather_ref[...],
                      preferred_element_type=jnp.float32)        # (2, 8)

    inv_count = jnp.float32(1.0 / (N * H * W))
    mean = stats_c[0:1, :] * inv_count                           # (1, 8)
    var = stats_c[1:2, :] * inv_count - mean * mean              # biased variance
    inv_std = lax.rsqrt(var + BN_EPS)

    gb = gb_ref[...]
    scale_c = gb[0:1, :] * inv_std                               # gamma / std
    shift_c = gb[1:2, :] - mean * scale_c                        # beta - mean*scale
    sc_sh = jnp.concatenate([scale_c, shift_c], axis=0)          # (2, 8)
    sc_sh_lane = jnp.dot(sc_sh, scatter_ref[...],
                         preferred_element_type=jnp.float32)     # (2, 128)

    # ---- Normalize + ReLU, dense 128-lane store.
    o_ref[...] = jnp.maximum(acc * sc_sh_lane[0:1, :] + sc_sh_lane[1:2, :], 0.0)


@jax.jit
def vgg_block(x_nchw, wt_slab, gb, gather_c, scatter_c):
    """x_nchw: (N, C_IN, H, W) f32 -> (N, C_OUT, H, W) f32."""
    # Pack input: NCHW -> NHWC, pad spatial by 1, fold (W+2, C_IN) into lanes,
    # then im2col along kh only and zero-pad the contraction axis to 256.
    x_nhwc = jnp.transpose(x_nchw, (0, 2, 3, 1))
    x_pad = jnp.pad(x_nhwc, ((0, 0), (1, 1), (1, 1), (0, 0)))
    x_rows = x_pad.reshape(N, H + 2, WPC)                        # (2, 18, 72)
    lhs = jnp.concatenate([x_rows[:, kh:kh + H, :] for kh in range(KH)],
                          axis=-1)                               # (2, 16, 216)
    lhs = jnp.pad(lhs, ((0, 0), (0, 0), (0, K_PAD - K_RAW)))     # (2, 16, 256)
    lhs = lhs.reshape(N * H, K_PAD).astype(jnp.bfloat16)         # (32, 256) bf16

    vmem = pl.BlockSpec(memory_space=pltpu.MemorySpace.VMEM)
    out_slab = pl.pallas_call(
        vgg_block_kernel,
        out_shape=jax.ShapeDtypeStruct((N * H, WC), jnp.float32),
        in_specs=[vmem, vmem, vmem, vmem, vmem],
        out_specs=vmem,
    )(lhs, wt_slab, gb, gather_c, scatter_c)                     # (32, 128)

    out_nhwc = out_slab.reshape(N, H, W, C_OUT)
    return jnp.transpose(out_nhwc, (0, 3, 1, 2))


def reference(x_nchw, w_hwio, b, gamma, beta):
    """Pure-JAX f32 reference matching torch Conv2d + BatchNorm2d(train) + ReLU."""
    x_nhwc = jnp.transpose(x_nchw, (0, 2, 3, 1))
    conv = lax.conv_general_dilated(
        x_nhwc, w_hwio, window_strides=(1, 1), padding="SAME",
        dimension_numbers=("NHWC", "HWIO", "NHWC"))
    conv = conv + b.reshape(1, 1, 1, C_OUT)
    mean = jnp.mean(conv, axis=(0, 1, 2), keepdims=True)
    var = jnp.mean((conv - mean) ** 2, axis=(0, 1, 2), keepdims=True)
    y = (conv - mean) * lax.rsqrt(var + BN_EPS)
    y = y * gamma.reshape(1, 1, 1, C_OUT) + beta.reshape(1, 1, 1, C_OUT)
    y = jnp.maximum(y, 0.0)
    return jnp.transpose(y, (0, 3, 1, 2))


if __name__ == "__main__":
    key = jax.random.PRNGKey(0)
    kx, kw, kb, kg, kbe = jax.random.split(key, 5)

    # Shapes per Conv2d(4, 8, 3, padding=1) + BatchNorm2d(8).
    x = jax.random.normal(kx, (N, C_IN, H, W), dtype=jnp.float32)
    w_hwio = jax.random.normal(kw, (KH, KW, C_IN, C_OUT), dtype=jnp.float32) * 0.1
    b = jax.random.normal(kb, (C_OUT,), dtype=jnp.float32) * 0.1
    gamma = 1.0 + 0.1 * jax.random.normal(kg, (C_OUT,), dtype=jnp.float32)
    beta = 0.1 * jax.random.normal(kbe, (C_OUT,), dtype=jnp.float32)

    # Conv bias is mathematically cancelled by training-mode BN mean
    # subtraction, so it is not passed to the kernel (see TODO at top).
    wt_slab = _prepare_conv_weights(w_hwio)          # hoisted: once per weight update
    gather_c, scatter_c = _bn_indicator_constants()  # compile-time constants
    gb = jnp.stack([gamma, beta], axis=0)            # (2, C_OUT) f32

    out = vgg_block(x, wt_slab, gb, gather_c, scatter_c)
    jax.block_until_ready(out)

    ref = reference(x, w_hwio, b, gamma, beta)
    assert out.shape == (N, C_OUT, H, W), out.shape
    err = float(jnp.max(jnp.abs(out - ref)))
    # bf16 MXU inputs vs the all-f32 reference: tolerance relaxed accordingly
    # (f32 accumulation + f32 BN stats keep the error well below this bound).
    assert jnp.allclose(out, ref, rtol=2e-2, atol=2e-2), err

    print("KERNEL_OK")
</pallas_src>

<mosaic_0001>
module attributes {stable_mosaic.version = 11 : i64} {
  func.func @vgg_block_kernel(%arg0: memref<32x256xbf16, #tpu.memory_space<vmem>>, %arg1: memref<256x128xbf16, #tpu.memory_space<vmem>>, %arg2: memref<2x8xf32, #tpu.memory_space<vmem>>, %arg3: memref<128x8xf32, #tpu.memory_space<vmem>>, %arg4: memref<8x128xf32, #tpu.memory_space<vmem>>, %arg5: memref<32x128xf32, #tpu.memory_space<vmem>>) attributes {dimension_semantics = [], scalar_prefetch = 0 : i64, scratch_operands = 0 : i64, tpu.core_type = #tpu.core_type<tc>} {
    %c0 = arith.constant 0 : index
    %c0_0 = arith.constant 0 : index
    %0 = vector.load %arg0[%c0, %c0_0] : memref<32x256xbf16, #tpu.memory_space<vmem>>, vector<32x256xbf16>
    %c0_1 = arith.constant 0 : index
    %c0_2 = arith.constant 0 : index
    %1 = vector.load %arg1[%c0_1, %c0_2] : memref<256x128xbf16, #tpu.memory_space<vmem>>, vector<256x128xbf16>
    %cst = arith.constant dense<0.000000e+00> : vector<32x128xf32>
    %2 = tpu.matmul %0, %1, %cst {dimension_numbers = #tpu.dot_dimension_numbers<[1], [0], [0], [1], [0, 0, 1, 1], [], []>} : vector<32x256xbf16>, vector<256x128xbf16>, vector<32x128xf32> -> vector<32x128xf32>
    %cst_3 = arith.constant dense<0.000000e+00> : vector<128xf32>
    %3 = vector.multi_reduction <add>, %2, %cst_3 [0] : vector<32x128xf32> to vector<128xf32>
    %4 = vector.shape_cast %3 : vector<128xf32> to vector<1x128xf32>
    %5 = arith.mulf %2, %2 : vector<32x128xf32>
    %cst_4 = arith.constant dense<0.000000e+00> : vector<128xf32>
    %6 = vector.multi_reduction <add>, %5, %cst_4 [0] : vector<32x128xf32> to vector<128xf32>
    %7 = vector.shape_cast %6 : vector<128xf32> to vector<1x128xf32>
    %8 = tpu.concatenate %4, %7 in 0 : vector<1x128xf32>, vector<1x128xf32> -> vector<2x128xf32>
    %c0_5 = arith.constant 0 : index
    %c0_6 = arith.constant 0 : index
    %9 = vector.load %arg3[%c0_5, %c0_6] : memref<128x8xf32, #tpu.memory_space<vmem>>, vector<128x8xf32>
    %cst_7 = arith.constant dense<0.000000e+00> : vector<2x8xf32>
    %10 = tpu.matmul %8, %9, %cst_7 {dimension_numbers = #tpu.dot_dimension_numbers<[1], [0], [0], [1], [0, 0, 1, 1], [], []>} : vector<2x128xf32>, vector<128x8xf32>, vector<2x8xf32> -> vector<2x8xf32>
    %11 = vector.extract_strided_slice %10 {offsets = [0, 0], sizes = [1, 8], strides = [1, 1]} : vector<2x8xf32> to vector<1x8xf32>
    %cst_8 = arith.constant 0.001953125 : f32
    %12 = vector.broadcast %cst_8 : f32 to vector<1x8xf32>
    %13 = arith.mulf %11, %12 : vector<1x8xf32>
    %14 = vector.extract_strided_slice %10 {offsets = [1, 0], sizes = [1, 8], strides = [1, 1]} : vector<2x8xf32> to vector<1x8xf32>
    %cst_9 = arith.constant 0.001953125 : f32
    %15 = vector.broadcast %cst_9 : f32 to vector<1x8xf32>
    %16 = arith.mulf %14, %15 : vector<1x8xf32>
    %17 = arith.mulf %13, %13 : vector<1x8xf32>
    %18 = arith.subf %16, %17 : vector<1x8xf32>
    %cst_10 = arith.constant 9.99999974E-6 : f32
    %19 = vector.broadcast %cst_10 : f32 to vector<1x8xf32>
    %20 = arith.addf %18, %19 : vector<1x8xf32>
    %21 = math.rsqrt %20 : vector<1x8xf32>
    %c0_11 = arith.constant 0 : index
    %c0_12 = arith.constant 0 : index
    %22 = vector.load %arg2[%c0_11, %c0_12] : memref<2x8xf32, #tpu.memory_space<vmem>>, vector<2x8xf32>
    %23 = vector.extract_strided_slice %22 {offsets = [0, 0], sizes = [1, 8], strides = [1, 1]} : vector<2x8xf32> to vector<1x8xf32>
    %24 = arith.mulf %23, %21 : vector<1x8xf32>
    %25 = vector.extract_strided_slice %22 {offsets = [1, 0], sizes = [1, 8], strides = [1, 1]} : vector<2x8xf32> to vector<1x8xf32>
    %26 = arith.mulf %13, %24 : vector<1x8xf32>
    %27 = arith.subf %25, %26 : vector<1x8xf32>
    %28 = tpu.concatenate %24, %27 in 0 : vector<1x8xf32>, vector<1x8xf32> -> vector<2x8xf32>
    %c0_13 = arith.constant 0 : index
    %c0_14 = arith.constant 0 : index
    %29 = vector.load %arg4[%c0_13, %c0_14] : memref<8x128xf32, #tpu.memory_space<vmem>>, vector<8x128xf32>
    %cst_15 = arith.constant dense<0.000000e+00> : vector<2x128xf32>
    %30 = tpu.matmul %28, %29, %cst_15 {dimension_numbers = #tpu.dot_dimension_numbers<[1], [0], [0], [1], [0, 0, 1, 1], [], []>} : vector<2x8xf32>, vector<8x128xf32>, vector<2x128xf32> -> vector<2x128xf32>
    %31 = vector.extract_strided_slice %30 {offsets = [0, 0], sizes = [1, 128], strides = [1, 1]} : vector<2x128xf32> to vector<1x128xf32>
    %32 = vector.broadcast %31 : vector<1x128xf32> to vector<32x128xf32>
    %33 = arith.mulf %2, %32 : vector<32x128xf32>
    %34 = vector.extract_strided_slice %30 {offsets = [1, 0], sizes = [1, 128], strides = [1, 1]} : vector<2x128xf32> to vector<1x128xf32>
    %35 = vector.broadcast %34 : vector<1x128xf32> to vector<32x128xf32>
    %36 = arith.addf %33, %35 : vector<32x128xf32>
    %cst_16 = arith.constant 0.000000e+00 : f32
    %37 = vector.broadcast %cst_16 : f32 to vector<32x128xf32>
    %38 = arith.maximumf %36, %37 : vector<32x128xf32>
    %c0_17 = arith.constant 0 : index
    %c0_18 = arith.constant 0 : index
    %39 = vector.load %arg5[%c0_17, %c0_18] : memref<32x128xf32, #tpu.memory_space<vmem>>, vector<32x128xf32>
    tpu.vector_store %arg5[%c0_17, %c0_18], %38 {strides = array<i32>} : memref<32x128xf32, #tpu.memory_space<vmem>>, vector<32x128xf32>,
    return
  }
}

</mosaic_0001>

<bundles_post_ra>
// kernel: vgg_block.1
= control target key start
LH: loop header
LB: loop body
LE: loop exit
PB: predicated region body
PF: predicated region fallthrough
CT: control target
= control target key end

     0   :  { %vm232_vm0 = vcmask 1040384   ;;  %vm299_vm4 = vcmask 64512   ;;  %s644_s1 = inlined_call_operand.vmem [shape: bf16[256,128], index: 1, kind: input, shape index: {}]   ;;  %s645_s0 = inlined_call_operand.vmem [shape: bf16[32,256], index: 0, kind: input, shape index: {}]   ;;  %s646_s3 = inlined_call_operand.vmem [shape: f32[128,8], index: 3, kind: input, shape index: {}]   ;;  %s647_s4 = inlined_call_operand.vmem [shape: f32[8,128], index: 4, kind: input, shape index: {}]   ;;  %s648_s2 = inlined_call_operand.vmem [shape: f32[2,8], index: 2, kind: input, shape index: {}]   ;;  %s649_s5 = inlined_call_operand.vmem [shape: f32[32,128], index: 5, kind: output, shape index: {}]  }
   0x1   :  { %v437_v0 = vld [vmem:[%s644_s1 + $0x38] sm:$0xff]  ;;  %v436_v2 = vld [vmem:[%s644_s1 + $0x30] sm:$0xff]  ;;  %v435_v4 = vld [vmem:[%s644_s1 + $0x28] sm:$0xff] }
   0x2   :  { %v445_v1 = vld [vmem:[%s644_s1 + $0x78] sm:$0xff]  ;;  %172 = vmatpush.bf16.msra.mxu0 %v437_v0  ;;  %v444_v3 = vld [vmem:[%s644_s1 + $0x70] sm:$0xff]  ;;  %446 = vmatpush.bf16.msra.mxu3 %v437_v0  ;;  %v443_v5 = vld [vmem:[%s644_s1 + $0x68] sm:$0xff] }
   0x3   :  { %191 = vmatpush.bf16.msra.mxu1 %v445_v1  ;;  %v434_v6 = vld [vmem:[%s644_s1 + $0x20] sm:$0xff]  ;;  %v433_v8 = vld [vmem:[%s644_s1 + $0x18] sm:$0xff]  ;;  %v432_v10 = vld [vmem:[%s644_s1 + $0x10] sm:$0xff] }
   0x4   :  { %v442_v7 = vld [vmem:[%s644_s1 + $0x60] sm:$0xff]  ;;  %v441_v9 = vld [vmem:[%s644_s1 + $0x58] sm:$0xff]  ;;  %v440_v11 = vld [vmem:[%s644_s1 + $0x50] sm:$0xff] }
   0x5   :  { %v431_v12 = vld [vmem:[%s644_s1 + $0x8] sm:$0xff]  ;;  %v430_v14 = vld [vmem:[%s644_s1] sm:$0xff]  ;;  %v355_v20 = vld [vmem:[%s645_s0 + $0x10] sm:$0xf] }
   0x6   :  { %173 = vmatpush.bf16.msra.mxu0 %v436_v2  ;;  %447 = vmatpush.bf16.msra.mxu3 %v436_v2  ;;  %v439_v13 = vld [vmem:[%s644_s1 + $0x48] sm:$0xff]  ;;  %v438_v15 = vld [vmem:[%s644_s1 + $0x40] sm:$0xff]  ;;  %v429_v21 = vld [vmem:[%s645_s0 + $0x14] sm:$0xf0] }
   0x7   :  { %192 = vmatpush.bf16.msra.mxu1 %v444_v3  ;;  %v347_v16 = vld [vmem:[%s645_s0] sm:$0xf]  ;;  %v427_v17 = vld [vmem:[%s645_s0 + $0x4] sm:$0xf0]  ;;  %v426_v18 = vld [vmem:[%s645_s0 + $0x4] sm:$0xf]  ;;  %v356_v24 = vor.u32 %v429_v21, %v355_v20 }
   0x8   :  { %v349_v19 = vld [vmem:[%s645_s0 + $0x8] sm:$0xf0]  ;;  %v348_v22 = vor.u32 %v427_v17, %v347_v16  ;;  %v428_v25 = vld [vmem:[%s645_s0 + $0x14] sm:$0xf]  ;;  %v357_v26 = vld [vmem:[%s645_s0 + $0x18] sm:$0xf0] }
   0x9   :  { %v352_v23 = vor.u32 %v426_v18, %v349_v19  ;;  %v360_v27 = vor.u32 %v428_v25, %v357_v26  ;;  %v249_v28 = vld [vmem:[%s646_s3 + $0x78] sm:$0xff]  ;;  %v248_v29 = vld [vmem:[%s646_s3 + $0x70] sm:$0xff]  ;;  %v247_v30 = vld [vmem:[%s646_s3 + $0x68] sm:$0xff] }
   0xa   :  { %174 = vmatpush.bf16.msra.mxu0 %v435_v4  ;;  %448 = vmatpush.bf16.msra.mxu3 %v435_v4  ;;  %v246_v31 = vld [vmem:[%s646_s3 + $0x60] sm:$0xff]  ;;  %v245_v32 = vld [vmem:[%s646_s3 + $0x58] sm:$0xff]  ;;  %v244_v33 = vld [vmem:[%s646_s3 + $0x50] sm:$0xff] }
   0xb   :  { %193 = vmatpush.bf16.msra.mxu1 %v443_v5  ;;  %250 = vmatpush.msra.mxu2 %v249_v28  ;;  %v243_v34 = vld [vmem:[%s646_s3 + $0x48] sm:$0xff]  ;;  %v242_v35 = vld [vmem:[%s646_s3 + $0x40] sm:$0xff]  ;;  %v241_v36 = vld [vmem:[%s646_s3 + $0x38] sm:$0xff] }
   0xc   :  { %v240_v37 = vld [vmem:[%s646_s3 + $0x30] sm:$0xff]  ;;  %v239_v38 = vld [vmem:[%s646_s3 + $0x28] sm:$0xff]  ;;  %v238_v40 = vld [vmem:[%s646_s3 + $0x20] sm:$0xff] }
   0xd   :  { %251 = vmatpush.msra.mxu2 %v248_v29  ;;  %v237_v41 = vld [vmem:[%s646_s3 + $0x18] sm:$0xff]  ;;  %v236_v43 = vld [vmem:[%s646_s3 + $0x10] sm:$0xff]  ;;  %v235_v44 = vld [vmem:[%s646_s3 + $0x8] sm:$0xff] }
   0xe   :  { %175 = vmatpush.bf16.msra.mxu0 %v434_v6  ;;  %449 = vmatpush.bf16.msra.mxu3 %v434_v6  ;;  %v234_v46 = vld [vmem:[%s646_s3] sm:$0xff] }
   0xf   :  { %194 = vmatpush.bf16.msra.mxu1 %v442_v7  ;;  %252 = vmatpush.msra.mxu2 %v247_v30  ;;  %v298_v19 = vld [vmem:[%s647_s4] sm:$0xff] }
  0x10   :  { %v287_v29 = vld [vmem:[%s648_s2] sm:$0x3] }
  0x11   :  { %253 = vmatpush.msra.mxu2 %v246_v31 }
  0x12   :  { %176 = vmatpush.bf16.msra.mxu0 %v433_v8  ;;  %450 = vmatpush.bf16.msra.mxu3 %v433_v8 }
  0x13   :  { %195 = vmatpush.bf16.msra.mxu1 %v441_v9  ;;  %254 = vmatpush.msra.mxu2 %v245_v32 }
  0x15   :  { %255 = vmatpush.msra.mxu2 %v244_v33 }
  0x16   :  { %177 = vmatpush.bf16.msra.mxu0 %v432_v10  ;;  %451 = vmatpush.bf16.msra.mxu3 %v432_v10 }
  0x17   :  { %196 = vmatpush.bf16.msra.mxu1 %v440_v11  ;;  %256 = vmatpush.msra.mxu2 %v243_v34 }
  0x19   :  { %257 = vmatpush.msra.mxu2 %v242_v35 }
  0x1a   :  { %178 = vmatpush.bf16.msra.mxu0 %v431_v12  ;;  %452 = vmatpush.bf16.msra.mxu3 %v431_v12 }
  0x1b   :  { %197 = vmatpush.bf16.msra.mxu1 %v439_v13  ;;  %258 = vmatpush.msra.mxu2 %v241_v36 }
  0x1d   :  { %259 = vmatpush.msra.mxu2 %v240_v37 }
  0x1e   :  { %179 = vmatpush.bf16.msra.mxu0 %v430_v14  ;;  %453 = vmatpush.bf16.msra.mxu3 %v430_v14 }
  0x1f   :  { %198 = vmatpush.bf16.msra.mxu1 %v438_v15  ;;  %260 = vmatpush.msra.mxu2 %v239_v38 }
  0x21   :  { %180 = vmatmul.bf16.vlgmr.msra.gmra.mxu0 %v348_v22  ;;  %185 = vmatmul.bf16.vlgmr.msra.gmra.mxu3 %v356_v24 }
  0x22   :  { %199 = vmatmul.bf16.vlgmr.msra.gmra.mxu1 %v352_v23  ;;  %261 = vmatpush.msra.mxu2 %v238_v40 }
  0x23   :  { %318 = vmatpush.msrb.mxu3 %v298_v19 }
  0x24   :  { %262 = vmatpush.msra.mxu2 %v237_v41 }
  0x26   :  { %263 = vmatpush.msra.mxu2 %v236_v43 }
  0x28   :  { %264 = vmatpush.msra.mxu2 %v235_v44 }
  0x2a   :  { %265 = vmatpush.msra.mxu2 %v234_v46 }
  0x32   :  { %204 = vmatmul.bf16.gmra.mxu1 %v360_v27 }
  0x9e   :  { %v181_v42 = vpop.f32.mrf.mxu0 }
  0x9f   :  { %v200_v39 = vpop.f32.mrf.mxu1 }
  0xa0   :  { %v608_v51 = vadd.f32 %v200_v39, %v181_v42 }
  0xa2   :  { %v219_v54 = vmul.f32 %v608_v51, %v608_v51 }
  0xa4   :  { %v186_v48 = vpop.f32.mrf.mxu3 }
  0xa6   :  { %v183_v47 = vpop.f32.mrf.mxu0 }
  0xa7   :  { %v202_v45 = vpop.f32.mrf.mxu1 }
  0xa8   :  { %v606_v50 = vadd.f32 %v202_v45, %v183_v47 }
  0xaa   :  { %v220_v53 = vmul.f32 %v606_v50, %v606_v50  ;;  %v210_v55 = vadd.f32 %v606_v50, %v608_v51 }
  0xac   :  { %v188_v57 = vpop.f32.mrf.mxu3  ;;  %v223_v59 = vadd.f32 %v220_v53, %v219_v54 }
  0xaf   :  { %v205_v49 = vpop.f32.mrf.mxu1 }
  0xb0   :  { %v610_v52 = vadd.f32 %v205_v49, %v186_v48 }
  0xb2   :  { %v221_v56 = vmul.f32 %v610_v52, %v610_v52  ;;  %v211_v60 = vadd.f32 %v210_v55, %v610_v52 }
  0xb4   :  { %v224_v62 = vadd.f32 %v223_v59, %v221_v56 }
  0xb7   :  { %v207_v58 = vpop.f32.mrf.mxu1 }
  0xb8   :  { %v208_v61 = vadd.f32 %v207_v58, %v188_v57 }
  0xba   :  { %v212_v63 = vadd.f32 %v211_v60, %v208_v61  ;;  %v222_v0 = vmul.f32 %v208_v61, %v208_v61 }
  0xbc   :  { %v213_v1 = vrot.slane %v212_v63, 4  ;;  %v225_v2 = vadd.f32 %v224_v62, %v222_v0 }
  0xbe   :  { %v214_v3 = vadd.f32 %v213_v1, %v212_v63  ;;  %v226_v4 = vrot.slane %v225_v2, 4 }
  0xc0   :  { %v215_v5 = vrot.slane %v214_v3, 2  ;;  %v227_v6 = vadd.f32 %v226_v4, %v225_v2 }
  0xc2   :  { %v216_v7 = vadd.f32 %v215_v5, %v214_v3  ;;  %v228_v8 = vrot.slane %v227_v6, 2 }
  0xc4   :  { %v217_v9 = vrot.slane %v216_v7, 1  ;;  %v229_v10 = vadd.f32 %v228_v8, %v227_v6 }
  0xc6   :  { %v230_v11 = vrot.slane %v229_v10, 1  ;;  %v218_v12 = vadd.f32 %v217_v9, %v216_v7 }
  0xc8   :  { %v231_v13 = vadd.f32 %v230_v11, %v229_v10 }
  0xca   :  { %v233_v14 = vsel %vm232_vm0, %v218_v12, %v231_v13 }
  0xcb   :  { %266 = vmatmul.f32.vlgmr.msra.gmra.mxu2 %v233_v14 }
 0x14e   :  { %v267_v15 = vpop.f32.mrf.mxu2 }
 0x14f   :  { %v270_v16 = vmul.f32 0.001953125, %v267_v15 }
 0x151   :  { %v271_v17 = vmul.f32 %v270_v16, %v270_v16 }
 0x153   :  { %v273_v18 = vrot.slane %v271_v17, 7 }
 0x155   :  { %v275_v20 = vsub.f32 %v270_v16, %v273_v18 }
 0x157   :  { %v276_v21 = vadd.f32 1e-05, %v275_v20 }
 0x159   :  { %454 = vrsqrt.f32 %v276_v21  ;;  %vm283_vm2 = vweird.f32 %v276_v21 }
 0x15f   :  { %v455_v22 = vpop.eup %454 }
 0x160   :  { %v278_v23 = vmul.f32 %v455_v22, %v276_v21  ;;  %vm284_vm1 = vweird.f32 %v455_v22 }
 0x161   :  { %vm285_vm3 = vmor %vm283_vm2, %vm284_vm1 }
 0x162   :  { %v279_v24 = vmul.f32 %v455_v22, %v278_v23 }
 0x164   :  { %v280_v25 = vmul.f32 0.5, %v279_v24 }
 0x166   :  { %v281_v26 = vsub.f32 1.5, %v280_v25 }
 0x168   :  { %v282_v27 = vmul.f32 %v455_v22, %v281_v26 }
 0x16a   :  { %v286_v28 = vsel %vm285_vm3, %v455_v22, %v282_v27 }
 0x16b   :  { %v289_v30 = vrot.slane %v286_v28, 1 }
 0x16d   :  { %v291_v31 = vmul.f32 %v289_v30, %v287_v29 }
 0x16f   :  { %v292_v32 = vmul.f32 %v291_v31, %v270_v16 }
 0x171   :  { %v294_v33 = vrot.slane %v292_v32, 7 }
 0x173   :  { %v296_v34 = vsub.f32 %v287_v29, %v294_v33 }
 0x175   :  { %v297_v35 = vsel %vm232_vm0, %v291_v31, %v296_v34 }
 0x176   :  { %425 = vmatmul.msk.f32.vlgmr.msrb.gmra.mxu3 %vm299_vm4, %v297_v35 }
 0x1f9   :  { %v320_v36 = vpop.f32.mrf.mxu3 }
 0x1fa   :  { %v323_v37 = vperm.slane %v320_v36, 0  ;;  %v328_v38 = vperm.slane %v320_v36, 1 }
 0x1fc   :  { %v324_v39 = vmul.f32 %v323_v37, %v608_v51  ;;  %v325_v40 = vmul.f32 %v323_v37, %v606_v50  ;;  %v326_v41 = vmul.f32 %v323_v37, %v610_v52  ;;  %v327_v42 = vmul.f32 %v323_v37, %v208_v61 }
 0x1fe   :  { %v329_v43 = vadd.f32 %v328_v38, %v324_v39  ;;  %v330_v44 = vadd.f32 %v328_v38, %v325_v40  ;;  %v331_v45 = vadd.f32 %v328_v38, %v326_v41  ;;  %v332_v46 = vadd.f32 %v328_v38, %v327_v42 }
 0x200   :  { %v333_v47 = vmax.f32 %v329_v43, 0.0  ;;  %v334_v48 = vmax.f32 %v330_v44, 0.0  ;;  %v335_v49 = vmax.f32 %v331_v45, 0.0  ;;  %v336_v53 = vmax.f32 %v332_v46, 0.0 }
 0x202   :  { %337 = vst [vmem:[%s649_s5] sm:$0xff] %v333_v47 }
 0x203   :  { %338 = vst [vmem:[%s649_s5 + $0x8] sm:$0xff] %v334_v48 }
 0x204   :  { %339 = vst [vmem:[%s649_s5 + $0x10] sm:$0xff] %v335_v49 }
 0x205   :  { %340 = vst [vmem:[%s649_s5 + $0x18] sm:$0xff] %v336_v53 }

</bundles_post_ra>
